<compile_context>
chip_gen: v7x
topology: tpu7x:2x2x1
jax: 0.10.0
libtpu: 0.0.40
codegen_flags: <defaults>
</compile_context>

<pallas_src>
import math
from functools import partial

import jax
import jax.numpy as jnp
from jax import lax
from jax.experimental import pallas as pl
from jax.experimental.pallas import tpu as pltpu


def _mhsa_kernel(xq_ref, kt_ref, v_ref, wq_ref, bq_ref, wo_ref, bo_ref,
                 o_ref, qh_ref, ctxh_ref, *, num_heads):
    """One (batch, query-tile) grid step.

    xq_ref  : (1, tq, D)     query tile of x (input dtype, e.g. f32)
    kt_ref  : (1, H, dk, S)  per-head K, pre-transposed, MXU dtype (bf16)
    v_ref   : (1, H, S, dk)  per-head V, MXU dtype
    wq_ref  : (D, D) MXU dtype, pre-scaled by 1/sqrt(dk);  bq_ref: (1, D) f32, pre-scaled
    wo_ref  : (D, D) MXU dtype;                            bo_ref: (1, D) f32
    o_ref   : (1, tq, D)     output tile
    qh_ref  : (H, tq, dk)    VMEM scratch, per-head Q (MXU dtype)
    ctxh_ref: (H, tq, dk)    VMEM scratch, per-head context (MXU dtype)
    """
    xq = xq_ref[0]                                        # (tq, D)
    _, _, dk, _ = kt_ref.shape
    mxu_dt = wq_ref.dtype

    # Q projection: one dense (tq, D) @ (D, D) MXU matmul, f32 accumulate.  W_Q / b_Q are
    # pre-scaled by 1/sqrt(dk) on the host, so the (tq, S) score matrices never need an
    # extra VPU rescale.
    q = jnp.dot(xq.astype(mxu_dt), wq_ref[...],
                preferred_element_type=jnp.float32) + bq_ref[...]
    q = q.astype(mxu_dt)                                  # (tq, D)

    # Stage per-head Q head-major with STATIC lane slices; the attention loop below then
    # only indexes leading (untiled) axes dynamically.
    for h in range(num_heads):                            # static: stores only, tiny live set
        qh_ref[h] = q[:, h * dk:(h + 1) * dk]

    def head_body(h, carry):
        qh = qh_ref[h]                                    # (tq, dk)  MXU dtype
        kt = kt_ref[0, h]                                 # (dk, S)   MXU dtype (pre-transposed)
        vh = v_ref[0, h]                                  # (S, dk)   MXU dtype
        s = jnp.dot(qh, kt, preferred_element_type=jnp.float32)        # (tq, S) f32
        # Numerically-stable softmax over the key axis, all in f32.
        s = s - jnp.max(s, axis=-1, keepdims=True)
        p = jnp.exp(s)
        attn = p / jnp.sum(p, axis=-1, keepdims=True)     # exact divide (module parity)
        ctxh_ref[h] = jnp.dot(attn.astype(mxu_dt), vh,
                              preferred_element_type=jnp.float32).astype(mxu_dt)
        return carry

    # fori_loop (not a Python unroll) bounds the live set to one head's f32 temporaries.
    lax.fori_loop(0, num_heads, head_body, 0)

    # Concatenate the heads back on the lane axis and run ONE dense output projection.
    ctx = jnp.concatenate([ctxh_ref[h] for h in range(num_heads)], axis=-1)   # (tq, D)
    out = jnp.dot(ctx, wo_ref[...], preferred_element_type=jnp.float32) + bo_ref[...]
    o_ref[0] = out.astype(o_ref.dtype)


def _project_kv_heads(x, params, num_heads, mxu_dtype):
    """K/V projection hoisted out of the kernel: one batched XLA matmul per projection
    (MXU-dtype operands, f32 accumulate), returned head-major with K pre-transposed."""
    B, S, D = x.shape
    dk = D // num_heads
    x_c = x.astype(mxu_dtype)
    k = jnp.dot(x_c, params["WK"].astype(mxu_dtype),
                preferred_element_type=jnp.float32) + params["bK"]      # (B, S, D) f32
    v = jnp.dot(x_c, params["WV"].astype(mxu_dtype),
                preferred_element_type=jnp.float32) + params["bV"]
    k_t = k.reshape(B, S, num_heads, dk).transpose(0, 2, 3, 1)          # (B, H, dk, S)
    v_h = v.reshape(B, S, num_heads, dk).transpose(0, 2, 1, 3)          # (B, H, S, dk)
    return k_t.astype(mxu_dtype), v_h.astype(mxu_dtype)


def _vmem_limit_bytes():
    # ~3/4 of physical VMEM: ~96 MiB on v5e/v6e (128 MiB parts), ~48 MiB on v7x (64 MiB).
    cap = 128 * 1024 * 1024
    try:
        cap = int(pltpu.get_tpu_info().vmem_capacity_bytes)
    except Exception:
        pass
    return int(cap * 3 // 4)


def _const_spec(shape):
    """BlockSpec for a weight identical at every grid step: single-buffered."""
    index_map = lambda b, qi: (0,) * len(shape)
    try:
        return pl.BlockSpec(shape, index_map, pipeline_mode=pl.Buffered(1))
    except Exception:   # older jax without pipeline_mode: fall back to default buffering
        return pl.BlockSpec(shape, index_map)


def multi_head_self_attention(x, params, num_heads, *, tq=None, mxu_dtype=jnp.bfloat16):
    """x: (B, S, D). params: dict from make_params. Returns (B, S, D) in x.dtype.

    mxu_dtype is the operand dtype of every matmul (bf16 = fast MXU path on v5e/v6e/v7x);
    accumulation and all softmax math stay f32.
    """
    B, S, D = x.shape
    assert D % num_heads == 0, "d_model must be divisible by num_attention_heads"
    dk = D // num_heads

    if tq is None:
        # Larger query tiles amortize the ~0.35us per-grid-step overhead and fill the
        # 256-row MXU on v6e/v7x; bounded by the (tq, S) f32 score block in VMEM.
        tq = S if S <= 256 else next(
            (t for t in (256, 128, 64, 32, 16, 8, 4, 2, 1) if S % t == 0), S)
    assert S % tq == 0, "query tile must divide the sequence length"

    scale = 1.0 / math.sqrt(dk)
    wq = (params["WQ"] * scale).astype(mxu_dtype)          # fold 1/sqrt(dk) into W_Q
    bq = (params["bQ"] * scale).reshape(1, D).astype(jnp.float32)
    wo = params["WO"].astype(mxu_dtype)
    bo = params["bO"].reshape(1, D).astype(jnp.float32)

    # K/V projection hoisted out of the per-query-tile loop (computed once per batch).
    k_t, v_h = _project_kv_heads(x, params, num_heads, mxu_dtype)

    # Advisory cost estimate (in-kernel work only) for XLA's scheduler.
    w_isz = jnp.dtype(mxu_dtype).itemsize
    cost = pl.CostEstimate(
        flops=int(4 * B * S * D * D + 4 * B * S * S * D),
        transcendentals=int(B * num_heads * S * S),
        bytes_accessed=int(B * S * D * x.dtype.itemsize          # x
                           + 2 * B * S * D * w_isz               # K^T, V
                           + 2 * D * D * w_isz + 2 * D * 4       # weights + biases
                           + B * S * D * x.dtype.itemsize))      # output

    return pl.pallas_call(
        partial(_mhsa_kernel, num_heads=num_heads),
        out_shape=jax.ShapeDtypeStruct((B, S, D), x.dtype),
        grid_spec=pltpu.PrefetchScalarGridSpec(
            num_scalar_prefetch=0,
            grid=(B, S // tq),
            in_specs=[
                pl.BlockSpec((1, tq, D), lambda b, qi: (b, qi, 0)),               # x tile
                pl.BlockSpec((1, num_heads, dk, S), lambda b, qi: (b, 0, 0, 0)),  # K^T (per b)
                pl.BlockSpec((1, num_heads, S, dk), lambda b, qi: (b, 0, 0, 0)),  # V   (per b)
                _const_spec((D, D)), _const_spec((1, D)),                         # W_Q, b_Q (pre-scaled)
                _const_spec((D, D)), _const_spec((1, D)),                         # W_O, b_O
            ],
            out_specs=pl.BlockSpec((1, tq, D), lambda b, qi: (b, qi, 0)),
            scratch_shapes=[
                pltpu.VMEM((num_heads, tq, dk), mxu_dtype),   # staged per-head Q
                pltpu.VMEM((num_heads, tq, dk), mxu_dtype),   # per-head context
            ],
        ),
        compiler_params=pltpu.CompilerParams(
            dimension_semantics=("parallel", "parallel"),     # batch and query tiles independent
            vmem_limit_bytes=_vmem_limit_bytes(),
        ),
        cost_estimate=cost,
    )(x, k_t, v_h, wq, bq, wo, bo)


def make_params(key, d_model):
    """Deterministic synthetic nn.Linear parameters, weights in (in, out) layout (= torch W.T)."""
    keys = jax.random.split(key, 8)
    bound = 1.0 / math.sqrt(d_model)
    w = lambda k: jax.random.uniform(k, (d_model, d_model), jnp.float32, -bound, bound)
    b = lambda k: jax.random.uniform(k, (d_model,), jnp.float32, -bound, bound)
    return {"WQ": w(keys[0]), "WK": w(keys[1]), "WV": w(keys[2]), "WO": w(keys[3]),
            "bQ": b(keys[4]), "bK": b(keys[5]), "bV": b(keys[6]), "bO": b(keys[7])}


def reference_mhsa(x, params, num_heads):
    """Pure-JAX f32 reference mirroring the PyTorch forward (Q=K=V=x, attn_mask=None)."""
    B, S, D = x.shape
    dk = D // num_heads
    proj = lambda W, b: (x @ W + b).reshape(B, S, num_heads, dk).transpose(0, 2, 1, 3)
    Q = proj(params["WQ"], params["bQ"])
    K = proj(params["WK"], params["bK"])
    V = proj(params["WV"], params["bV"])
    scores = jnp.einsum("bhqd,bhkd->bhqk", Q, K) / math.sqrt(dk)
    attn = jax.nn.softmax(scores, axis=-1)
    ctx = jnp.einsum("bhqk,bhkd->bhqd", attn, V)
    ctx = ctx.transpose(0, 2, 1, 3).reshape(B, S, D)
    return ctx @ params["WO"] + params["bO"]


if __name__ == "__main__":
    B, S, d_model, num_heads = 2, 8, 32, 4

    key = jax.random.PRNGKey(0)
    kx, kp = jax.random.split(key)
    x = jax.random.normal(kx, (B, S, d_model), jnp.float32)
    params = make_params(kp, d_model)

    out = multi_head_self_attention(x, params, num_heads)     # bf16 MXU-operand path
    out = jax.block_until_ready(out)
    assert out.shape == (B, S, d_model)

    ref = reference_mhsa(x, params, num_heads)
    # bf16 matmul operands (f32 accumulate, f32 softmax) drift by ~1e-3 vs. the exact-f32
    # reference at these magnitudes; 5e-2 keeps a healthy margin while still catching any
    # structural error (wrong head slice, wrong softmax axis, ...).
    assert jnp.allclose(out, ref, rtol=5e-2, atol=5e-2), "mismatch vs reference"

    print("KERNEL_OK")
</pallas_src>

<mosaic_0001>
module attributes {stable_mosaic.version = 11 : i64} {
  func.func @_mhsa_kernel(%arg0: i32, %arg1: i32, %arg2: memref<1x8x32xf32, #tpu.memory_space<vmem>>, %arg3: memref<1x4x8x8xbf16, #tpu.memory_space<vmem>>, %arg4: memref<1x4x8x8xbf16, #tpu.memory_space<vmem>>, %arg5: memref<32x32xbf16, #tpu.memory_space<vmem>>, %arg6: memref<1x32xf32, #tpu.memory_space<vmem>>, %arg7: memref<32x32xbf16, #tpu.memory_space<vmem>>, %arg8: memref<1x32xf32, #tpu.memory_space<vmem>>, %arg9: memref<1x8x32xf32, #tpu.memory_space<vmem>>, %arg10: memref<4x8x8xbf16, #tpu.memory_space<vmem>>, %arg11: memref<4x8x8xbf16, #tpu.memory_space<vmem>>) attributes {dimension_semantics = [#tpu.dimension_semantics<parallel>, #tpu.dimension_semantics<parallel>], iteration_bounds = array<i64: 2, 1>, scalar_prefetch = 0 : i64, scratch_operands = 2 : i64, tpu.core_type = #tpu.core_type<tc>, window_params = [{transform_indices = @transform_0, window_bounds = array<i64: 1, 8, 32>}, {transform_indices = @transform_1, window_bounds = array<i64: 1, 4, 8, 8>}, {transform_indices = @transform_2, window_bounds = array<i64: 1, 4, 8, 8>}, {pipeline_mode = #tpu.pipeline_mode<synchronous>, transform_indices = @transform_3, window_bounds = array<i64: 32, 32>}, {pipeline_mode = #tpu.pipeline_mode<synchronous>, transform_indices = @transform_4, window_bounds = array<i64: 1, 32>}, {pipeline_mode = #tpu.pipeline_mode<synchronous>, transform_indices = @transform_5, window_bounds = array<i64: 32, 32>}, {pipeline_mode = #tpu.pipeline_mode<synchronous>, transform_indices = @transform_6, window_bounds = array<i64: 1, 32>}, {transform_indices = @transform_7, window_bounds = array<i64: 1, 8, 32>}]} {
    %c0 = arith.constant 0 : index
    %c0_0 = arith.constant 0 : index
    %c0_1 = arith.constant 0 : index
    %0 = vector.load %arg2[%c0, %c0_0, %c0_1] : memref<1x8x32xf32, #tpu.memory_space<vmem>>, vector<1x8x32xf32>
    %1 = vector.shape_cast %0 : vector<1x8x32xf32> to vector<8x32xf32>
    %2 = arith.truncf %1 : vector<8x32xf32> to vector<8x32xbf16>
    %c0_2 = arith.constant 0 : index
    %c0_3 = arith.constant 0 : index
    %3 = vector.load %arg5[%c0_2, %c0_3] : memref<32x32xbf16, #tpu.memory_space<vmem>>, vector<32x32xbf16>
    %cst = arith.constant dense<0.000000e+00> : vector<8x32xf32>
    %4 = tpu.matmul %2, %3, %cst {dimension_numbers = #tpu.dot_dimension_numbers<[1], [0], [0], [1], [0, 0, 1, 1], [], []>} : vector<8x32xbf16>, vector<32x32xbf16>, vector<8x32xf32> -> vector<8x32xf32>
    %c0_4 = arith.constant 0 : index
    %c0_5 = arith.constant 0 : index
    %5 = vector.load %arg6[%c0_4, %c0_5] : memref<1x32xf32, #tpu.memory_space<vmem>>, vector<1x32xf32>
    %6 = vector.broadcast %5 : vector<1x32xf32> to vector<8x32xf32>
    %7 = arith.addf %4, %6 : vector<8x32xf32>
    %8 = arith.truncf %7 : vector<8x32xf32> to vector<8x32xbf16>
    %9 = vector.extract_strided_slice %8 {offsets = [0, 0], sizes = [8, 8], strides = [1, 1]} : vector<8x32xbf16> to vector<8x8xbf16>
    %c0_6 = arith.constant 0 : index
    %c0_7 = arith.constant 0 : index
    %c0_8 = arith.constant 0 : index
    %10 = vector.load %arg10[%c0_6, %c0_7, %c0_8] : memref<4x8x8xbf16, #tpu.memory_space<vmem>>, vector<1x8x8xbf16>
    %11 = vector.shape_cast %10 : vector<1x8x8xbf16> to vector<8x8xbf16>
    %12 = vector.shape_cast %9 : vector<8x8xbf16> to vector<1x8x8xbf16>
    tpu.vector_store %arg10[%c0_6, %c0_7, %c0_8], %12 {strides = array<i32>} : memref<4x8x8xbf16, #tpu.memory_space<vmem>>, vector<1x8x8xbf16>,
    %13 = vector.extract_strided_slice %8 {offsets = [0, 8], sizes = [8, 8], strides = [1, 1]} : vector<8x32xbf16> to vector<8x8xbf16>
    %c1 = arith.constant 1 : index
    %c0_9 = arith.constant 0 : index
    %c0_10 = arith.constant 0 : index
    %14 = vector.load %arg10[%c1, %c0_9, %c0_10] : memref<4x8x8xbf16, #tpu.memory_space<vmem>>, vector<1x8x8xbf16>
    %15 = vector.shape_cast %14 : vector<1x8x8xbf16> to vector<8x8xbf16>
    %16 = vector.shape_cast %13 : vector<8x8xbf16> to vector<1x8x8xbf16>
    tpu.vector_store %arg10[%c1, %c0_9, %c0_10], %16 {strides = array<i32>} : memref<4x8x8xbf16, #tpu.memory_space<vmem>>, vector<1x8x8xbf16>,
    %17 = vector.extract_strided_slice %8 {offsets = [0, 16], sizes = [8, 8], strides = [1, 1]} : vector<8x32xbf16> to vector<8x8xbf16>
    %c2 = arith.constant 2 : index
    %c0_11 = arith.constant 0 : index
    %c0_12 = arith.constant 0 : index
    %18 = vector.load %arg10[%c2, %c0_11, %c0_12] : memref<4x8x8xbf16, #tpu.memory_space<vmem>>, vector<1x8x8xbf16>
    %19 = vector.shape_cast %18 : vector<1x8x8xbf16> to vector<8x8xbf16>
    %20 = vector.shape_cast %17 : vector<8x8xbf16> to vector<1x8x8xbf16>
    tpu.vector_store %arg10[%c2, %c0_11, %c0_12], %20 {strides = array<i32>} : memref<4x8x8xbf16, #tpu.memory_space<vmem>>, vector<1x8x8xbf16>,
    %21 = vector.extract_strided_slice %8 {offsets = [0, 24], sizes = [8, 8], strides = [1, 1]} : vector<8x32xbf16> to vector<8x8xbf16>
    %c3 = arith.constant 3 : index
    %c0_13 = arith.constant 0 : index
    %c0_14 = arith.constant 0 : index
    %22 = vector.load %arg10[%c3, %c0_13, %c0_14] : memref<4x8x8xbf16, #tpu.memory_space<vmem>>, vector<1x8x8xbf16>
    %23 = vector.shape_cast %22 : vector<1x8x8xbf16> to vector<8x8xbf16>
    %24 = vector.shape_cast %21 : vector<8x8xbf16> to vector<1x8x8xbf16>
    tpu.vector_store %arg10[%c3, %c0_13, %c0_14], %24 {strides = array<i32>} : memref<4x8x8xbf16, #tpu.memory_space<vmem>>, vector<1x8x8xbf16>,
    %c0_i32 = arith.constant 0 : i32
    %c4_i32 = arith.constant 4 : i32
    %25 = arith.addi %c0_i32, %c4_i32 : i32
    %c1_i32 = arith.constant 1 : i32
    scf.for %arg12 = %c0_i32 to %25 step %c1_i32  : i32 {
      %43 = arith.index_cast %arg12 : i32 to index
      %c0_36 = arith.constant 0 : index
      %c0_37 = arith.constant 0 : index
      %44 = vector.load %arg10[%43, %c0_36, %c0_37] : memref<4x8x8xbf16, #tpu.memory_space<vmem>>, vector<1x8x8xbf16>
      %45 = vector.shape_cast %44 : vector<1x8x8xbf16> to vector<8x8xbf16>
      %c0_38 = arith.constant 0 : index
      %46 = arith.index_cast %arg12 : i32 to index
      %c0_39 = arith.constant 0 : index
      %c0_40 = arith.constant 0 : index
      %47 = vector.load %arg3[%c0_38, %46, %c0_39, %c0_40] : memref<1x4x8x8xbf16, #tpu.memory_space<vmem>>, vector<1x1x8x8xbf16>
      %48 = vector.shape_cast %47 : vector<1x1x8x8xbf16> to vector<8x8xbf16>
      %c0_41 = arith.constant 0 : index
      %49 = arith.index_cast %arg12 : i32 to index
      %c0_42 = arith.constant 0 : index
      %c0_43 = arith.constant 0 : index
      %50 = vector.load %arg4[%c0_41, %49, %c0_42, %c0_43] : memref<1x4x8x8xbf16, #tpu.memory_space<vmem>>, vector<1x1x8x8xbf16>
      %51 = vector.shape_cast %50 : vector<1x1x8x8xbf16> to vector<8x8xbf16>
      %cst_44 = arith.constant dense<0.000000e+00> : vector<8x8xf32>
      %52 = tpu.matmul %45, %48, %cst_44 {dimension_numbers = #tpu.dot_dimension_numbers<[1], [0], [0], [1], [0, 0, 1, 1], [], []>} : vector<8x8xbf16>, vector<8x8xbf16>, vector<8x8xf32> -> vector<8x8xf32>
      %cst_45 = arith.constant dense<0xFF800000> : vector<8xf32>
      %53 = vector.multi_reduction <maximumf>, %52, %cst_45 [1] : vector<8x8xf32> to vector<8xf32>
      %54 = vector.shape_cast %53 : vector<8xf32> to vector<8x1xf32>
      %55 = vector.broadcast %54 : vector<8x1xf32> to vector<8x8xf32>
      %56 = arith.subf %52, %55 : vector<8x8xf32>
      %57 = math.exp %56 : vector<8x8xf32>
      %cst_46 = arith.constant dense<0.000000e+00> : vector<8xf32>
      %58 = vector.multi_reduction <add>, %57, %cst_46 [1] : vector<8x8xf32> to vector<8xf32>
      %59 = vector.shape_cast %58 : vector<8xf32> to vector<8x1xf32>
      %60 = vector.broadcast %59 : vector<8x1xf32> to vector<8x8xf32>
      %61 = arith.divf %57, %60 : vector<8x8xf32>
      %62 = arith.truncf %61 : vector<8x8xf32> to vector<8x8xbf16>
      %cst_47 = arith.constant dense<0.000000e+00> : vector<8x8xf32>
      %63 = tpu.matmul %62, %51, %cst_47 {dimension_numbers = #tpu.dot_dimension_numbers<[1], [0], [0], [1], [0, 0, 1, 1], [], []>} : vector<8x8xbf16>, vector<8x8xbf16>, vector<8x8xf32> -> vector<8x8xf32>
      %64 = arith.truncf %63 : vector<8x8xf32> to vector<8x8xbf16>
      %65 = arith.index_cast %arg12 : i32 to index
      %c0_48 = arith.constant 0 : index
      %c0_49 = arith.constant 0 : index
      %66 = vector.load %arg11[%65, %c0_48, %c0_49] : memref<4x8x8xbf16, #tpu.memory_space<vmem>>, vector<1x8x8xbf16>
      %67 = vector.shape_cast %66 : vector<1x8x8xbf16> to vector<8x8xbf16>
      %68 = vector.shape_cast %64 : vector<8x8xbf16> to vector<1x8x8xbf16>
      tpu.vector_store %arg11[%65, %c0_48, %c0_49], %68 {strides = array<i32>} : memref<4x8x8xbf16, #tpu.memory_space<vmem>>, vector<1x8x8xbf16>,
    }
    %c4_i32_15 = arith.constant 4 : i32
    %c0_16 = arith.constant 0 : index
    %c0_17 = arith.constant 0 : index
    %c0_18 = arith.constant 0 : index
    %26 = vector.load %arg11[%c0_16, %c0_17, %c0_18] : memref<4x8x8xbf16, #tpu.memory_space<vmem>>, vector<1x8x8xbf16>
    %27 = vector.shape_cast %26 : vector<1x8x8xbf16> to vector<8x8xbf16>
    %c1_19 = arith.constant 1 : index
    %c0_20 = arith.constant 0 : index
    %c0_21 = arith.constant 0 : index
    %28 = vector.load %arg11[%c1_19, %c0_20, %c0_21] : memref<4x8x8xbf16, #tpu.memory_space<vmem>>, vector<1x8x8xbf16>
    %29 = vector.shape_cast %28 : vector<1x8x8xbf16> to vector<8x8xbf16>
    %c2_22 = arith.constant 2 : index
    %c0_23 = arith.constant 0 : index
    %c0_24 = arith.constant 0 : index
    %30 = vector.load %arg11[%c2_22, %c0_23, %c0_24] : memref<4x8x8xbf16, #tpu.memory_space<vmem>>, vector<1x8x8xbf16>
    %31 = vector.shape_cast %30 : vector<1x8x8xbf16> to vector<8x8xbf16>
    %c3_25 = arith.constant 3 : index
    %c0_26 = arith.constant 0 : index
    %c0_27 = arith.constant 0 : index
    %32 = vector.load %arg11[%c3_25, %c0_26, %c0_27] : memref<4x8x8xbf16, #tpu.memory_space<vmem>>, vector<1x8x8xbf16>
    %33 = vector.shape_cast %32 : vector<1x8x8xbf16> to vector<8x8xbf16>
    %34 = tpu.concatenate %27, %29, %31, %33 in 1 : vector<8x8xbf16>, vector<8x8xbf16>, vector<8x8xbf16>, vector<8x8xbf16> -> vector<8x32xbf16>
    %c0_28 = arith.constant 0 : index
    %c0_29 = arith.constant 0 : index
    %35 = vector.load %arg7[%c0_28, %c0_29] : memref<32x32xbf16, #tpu.memory_space<vmem>>, vector<32x32xbf16>
    %cst_30 = arith.constant dense<0.000000e+00> : vector<8x32xf32>
    %36 = tpu.matmul %34, %35, %cst_30 {dimension_numbers = #tpu.dot_dimension_numbers<[1], [0], [0], [1], [0, 0, 1, 1], [], []>} : vector<8x32xbf16>, vector<32x32xbf16>, vector<8x32xf32> -> vector<8x32xf32>
    %c0_31 = arith.constant 0 : index
    %c0_32 = arith.constant 0 : index
    %37 = vector.load %arg8[%c0_31, %c0_32] : memref<1x32xf32, #tpu.memory_space<vmem>>, vector<1x32xf32>
    %38 = vector.broadcast %37 : vector<1x32xf32> to vector<8x32xf32>
    %39 = arith.addf %36, %38 : vector<8x32xf32>
    %c0_33 = arith.constant 0 : index
    %c0_34 = arith.constant 0 : index
    %c0_35 = arith.constant 0 : index
    %40 = vector.load %arg9[%c0_33, %c0_34, %c0_35] : memref<1x8x32xf32, #tpu.memory_space<vmem>>, vector<1x8x32xf32>
    %41 = vector.shape_cast %40 : vector<1x8x32xf32> to vector<8x32xf32>
    %42 = vector.shape_cast %39 : vector<8x32xf32> to vector<1x8x32xf32>
    tpu.vector_store %arg9[%c0_33, %c0_34, %c0_35], %42 {strides = array<i32>} : memref<1x8x32xf32, #tpu.memory_space<vmem>>, vector<1x8x32xf32>,
    return
  }
  func.func @transform_0(%arg0: i32, %arg1: i32) -> (i32, i32, i32) {
    %c0_i32 = arith.constant 0 : i32
    %c0_i32_0 = arith.constant 0 : i32
    return %arg0, %arg1, %c0_i32 : i32, i32, i32
  }
  func.func @transform_1(%arg0: i32, %arg1: i32) -> (i32, i32, i32, i32) {
    %c0_i32 = arith.constant 0 : i32
    %c0_i32_0 = arith.constant 0 : i32
    %c0_i32_1 = arith.constant 0 : i32
    %c0_i32_2 = arith.constant 0 : i32
    return %arg0, %c0_i32, %c0_i32_0, %c0_i32_1 : i32, i32, i32, i32
  }
  func.func @transform_2(%arg0: i32, %arg1: i32) -> (i32, i32, i32, i32) {
    %c0_i32 = arith.constant 0 : i32
    %c0_i32_0 = arith.constant 0 : i32
    %c0_i32_1 = arith.constant 0 : i32
    %c0_i32_2 = arith.constant 0 : i32
    return %arg0, %c0_i32, %c0_i32_0, %c0_i32_1 : i32, i32, i32, i32
  }
  func.func @transform_3(%arg0: i32, %arg1: i32) -> (i32, i32) {
    %c0_i32 = arith.constant 0 : i32
    %c0_i32_0 = arith.constant 0 : i32
    %c0_i32_1 = arith.constant 0 : i32
    return %c0_i32, %c0_i32_0 : i32, i32
  }
  func.func @transform_4(%arg0: i32, %arg1: i32) -> (i32, i32) {
    %c0_i32 = arith.constant 0 : i32
    %c0_i32_0 = arith.constant 0 : i32
    %c0_i32_1 = arith.constant 0 : i32
    return %c0_i32, %c0_i32_0 : i32, i32
  }
  func.func @transform_5(%arg0: i32, %arg1: i32) -> (i32, i32) {
    %c0_i32 = arith.constant 0 : i32
    %c0_i32_0 = arith.constant 0 : i32
    %c0_i32_1 = arith.constant 0 : i32
    return %c0_i32, %c0_i32_0 : i32, i32
  }
  func.func @transform_6(%arg0: i32, %arg1: i32) -> (i32, i32) {
    %c0_i32 = arith.constant 0 : i32
    %c0_i32_0 = arith.constant 0 : i32
    %c0_i32_1 = arith.constant 0 : i32
    return %c0_i32, %c0_i32_0 : i32, i32
  }
  func.func @transform_7(%arg0: i32, %arg1: i32) -> (i32, i32, i32) {
    %c0_i32 = arith.constant 0 : i32
    %c0_i32_0 = arith.constant 0 : i32
    return %arg0, %arg1, %c0_i32 : i32, i32, i32
  }
}

</mosaic_0001>

<bundles_post_ra>
// kernel: tpu_custom_call.1
= control target key start
LH: loop header
LB: loop body
LE: loop exit
PB: predicated region body
PF: predicated region fallthrough
CT: control target
= control target key end

     0   :  { %s1973_s0 = inlined_call_operand.hbm [shape: f32[2,8,32], index: 0, kind: input, shape index: {}]   ;;  %s1974_s1 = inlined_call_operand.hbm [shape: bf16[2,4,8,8], index: 1, kind: input, shape index: {}]   ;;  %s1975_s2 = inlined_call_operand.hbm [shape: bf16[2,4,8,8], index: 2, kind: input, shape index: {}]   ;;  %s1976_s3 = inlined_call_operand.hbm [shape: bf16[32,32], index: 3, kind: input, shape index: {}]   ;;  %s1977_s4 = inlined_call_operand.hbm [shape: f32[1,32], index: 4, kind: input, shape index: {}]   ;;  %s1978_s5 = inlined_call_operand.hbm [shape: bf16[32,32], index: 5, kind: input, shape index: {}]   ;;  %s1979_s6 = inlined_call_operand.hbm [shape: f32[1,32], index: 6, kind: input, shape index: {}]   ;;  %s1980_s7 = inlined_call_operand.hbm [shape: f32[2,8,32], index: 7, kind: output, shape index: {}]  }
   0x1   :  { %2012 = sst [smem:[#allocation32_spill]] %s1974_s1 }
   0x2   :  { %2013 = sst [smem:[#allocation33_spill]] %s1976_s3 }
   0x3   :  { %2014 = sst [smem:[#allocation34_spill]] %s1978_s5 }
   0x4   :  { %2015 = sst [smem:[#allocation35_spill]] %s1980_s7 }
   0x5   :  { %12 = vsyncpa [#allocation5], 0 }
   0x6   :  { %14 = vsyncpa [#allocation5 + $0x1], 0 }
   0x7   :  { %15 = vsyncpa [#allocation8], 0 }
   0x8   :  { %17 = vsyncpa [#allocation8 + $0x1], 0 }
   0x9   :  { %18 = vsyncpa [#allocation11], 0 }
   0xa   :  { %19 = vsyncpa [#allocation14], 0 }
   0xb   :  { %20 = vsyncpa [#allocation6], 0 }
   0xc   :  { %22 = vsyncpa [#allocation6 + $0x1], 0  ;;  %s1543_s24 = smov 0   ;;  %s1545_s25 = smov 0  }
   0xd   :  { %s1547_s26 = smov 0   ;;  %s1549_s27 = smov 0  }
   0xe   :  { %s1551_s28 = smov 0   ;;  %s1553_s29 = smov 0  }
   0xf LB: > { %2016 = sst [smem:[#allocation22_spill]] %s1457_s24  ;;  %s1574_s30 = sadd.s32 4294967295, %s1477_s29   ;;  %s1477_s29 = sphi %s1553_s29, %s28_s29   ;;  %s1473_s28 = sphi %s1551_s28, %s2069_s28   ;;  %s1469_s27 = sphi %s1549_s27, %s2068_s27   ;;  %s1465_s26 = sphi %s1547_s26, %s2064_s26   ;;  %s1461_s25 = sphi %s1545_s25, %s2067_s25   ;;  %s1457_s24 = sphi %s1543_s24, %s2066_s24  }
  0x10   : > { %2017 = sst [smem:[#allocation23_spill]] %s1465_s26  ;;  %s946_s8 = sadd.s32 4294967294, %s1477_s29  }
  0x11   : > { %2018 = sst [smem:[#allocation24_spill]] %s1469_s27  ;;  %p62_p0 = scmp.ne.s32.totalorder %s1461_s25, %s1457_s24 }
  0x12   : > { %2019 = sst [smem:[#allocation25_spill]] %s1477_s29  ;;  %p1981_p1 = scmp.eq.s32.totalorder %s1574_s30, 0 }
  0x13   : > { %2020 = sst [smem:[#allocation26_spill]] %s1574_s30  ;;  %p230_p3 = scmp.eq.s32.totalorder %s946_s8, 1 }
  0x14   : > { %p1583_p4 = por %p1981_p1, %p62_p0  ;;  %p947_p5 = scmp.ge.s32.totalorder %s1477_s29, 1 }
  0x15   : > { %p1588_p6 = por %p230_p3, %p62_p0  ;;  %p237_p7 = scmp.lt.s32.totalorder %s1477_s29, 3 }
  0x16   : > { %s2021_s9 = scalar_select %p1583_p4, 1, 0 }
  0x17   : > { %s2023_s10 = scalar_select %p1588_p6, 1, 0 }
  0x18   : > { %2022 = sst [smem:[#allocation27_spill]] %s2021_s9  ;;  %p1593_p8 = pnand %p947_p5, %p237_p7 }
  0x19   : > { %2024 = sst [smem:[#allocation28_spill]] %s2023_s10  ;;  %s1483_s12 = smov [#allocation10]  }
  0x1a   : > { %s2025_s11 = scalar_select %p1593_p8, 1, 0 }
  0x1b   : > { %s249_s13 = sshll.u32 %s1483_s12, 4  ;;  %p1057_p9 = pneg %p1593_p8  ;;  %s1597_s13 = int_to_ptr.vmem [resolvable:$true] %s249_s13 }
  0x1c   : > { %s1484_s15 = smov [#allocation13]   ;;  %s2027_s3 = sld [smem:[#allocation33_spill]] }
  0x1d   : > { %p1604_p11 = pnand %p1057_p9, %p1981_p1  ;;  %s273_s16 = sshll.u32 %s1484_s15, 4  ;;  %s1608_s16 = int_to_ptr.vmem [resolvable:$true] %s273_s16 }
  0x1f   : > { %s2026_s14 = scalar_select %p1604_p11, 1, 0 }
  0x20   : > { %p1618_p13 = pneg %p1604_p11 }
  0x22   : > { %s1177_s19 = scalar_lea.hbm %s2027_s3, 256 }
  0x23   : > { %p1178_p12 = scmp.ne.s32.totalorder %s2027_s3, %s1177_s19  ;;  %p1184_p5 = scmp.lt.u32.totalorder %s1177_s19, %s2027_s3 }
  0x24   : > { %s2028_s22 = scalar_select %p1618_p13, 1, 0 }
  0x25   : > { %p1180_p0 = pnand %p1618_p13, %p1178_p12 }
  0x27   : > { %p1181_p3 = pneg %p1180_p0 }
  0x29   : > { %p1186_p7 = pnand %p1184_p5, %p1181_p3 }
  0x2b   : > { %1189 = shalt.err (!%p1186_p7)
}
  0x2c   : > { %s1190_s12 = scalar_lea.vmem %s1597_s13, 256  ;;  %p1198_p2 = scmp.lt.s32.totalorder %s1597_s13, %s1597_s13 }
  0x2d   : > { %p1191_p9 = scmp.ne.s32.totalorder %s1597_s13, %s1190_s12  ;;  %p1199_p6 = scmp.lt.s32.totalorder %s1190_s12, %s1190_s12 }
  0x2f   : > { %p1193_p10 = pnand %p1191_p9, %p1618_p13  ;;  %p1200_p12 = por %p1199_p6, %p1198_p2 }
  0x31   : > { %p1194_p1 = pneg %p1193_p10 }
  0x33   : > { %p1201_p0 = pnand %p1200_p12, %p1194_p1 }
  0x35   : > { %1204 = shalt.err (!%p1201_p0)
}
  0x36   : > { %s1984_s15 = smov 64   ;;  %s1986_s17 = smov 4  }
  0x37   : > { %1060 = dma.hbm_to_vmem [thread:$0]  (!%p1604_p11), %s2027_s3, 256, %s1597_s13, [#allocation11], %s1984_s15, %s1984_s15, %s1986_s17  }
  0x38   : > { %s2029_s5 = sld [smem:[#allocation34_spill]] }
  0x3e   : > { %s1205_s23 = scalar_lea.hbm %s2029_s5, 256 }
  0x3f   : > { %p1206_p1 = scmp.ne.s32.totalorder %s2029_s5, %s1205_s23  ;;  %p1212_p10 = scmp.lt.u32.totalorder %s1205_s23, %s2029_s5 }
  0x41   : > { %p1208_p2 = pnand %p1206_p1, %p1618_p13 }
  0x43   : > { %p1209_p6 = pneg %p1208_p2 }
  0x45   : > { %p1214_p3 = pnand %p1212_p10, %p1209_p6 }
  0x47   : > { %1217 = shalt.err (!%p1214_p3)
}
  0x48   : > { %s1218_s13 = scalar_lea.vmem %s1608_s16, 256  ;;  %p1226_p12 = scmp.lt.s32.totalorder %s1608_s16, %s1608_s16 }
  0x49   : > { %p1219_p5 = scmp.ne.s32.totalorder %s1608_s16, %s1218_s13  ;;  %p1227_p0 = scmp.lt.s32.totalorder %s1218_s13, %s1218_s13 }
  0x4b   : > { %p1221_p7 = pnand %p1219_p5, %p1618_p13  ;;  %p1228_p1 = por %p1227_p0, %p1226_p12 }
  0x4d   : > { %p1222_p9 = pneg %p1221_p7 }
  0x4f   : > { %p1229_p2 = pnand %p1228_p1, %p1222_p9 }
  0x51   : > { %1232 = shalt.err (!%p1229_p2)
}
  0x52   : > { %1066 = dma.hbm_to_vmem [thread:$0]  (!%p1604_p11), %s2029_s5, 256, %s1608_s16, [#allocation14], %s1984_s15, %s1984_s15, %s1986_s17  }
  0x53   : > { %s40_s18 = sadd.s32 1, %s1473_s28  ;;  %s49_s19 = sadd.s32 1, %s1465_s26 }
  0x54   : > { %p42_p6 = scmp.ge.s32.totalorder %s40_s18, 2  ;;  %p56_p10 = scmp.ne.s32.totalorder %s1465_s26, %s1461_s25 }
  0x55   : > { %p57_p3 = scmp.eq.s32.totalorder %s1477_s29, 0  ;;  %p1088_p5 = scmp.lt.s32.totalorder %s1477_s29, 2 }
  0x56   : > { %s2071_s18 = smov (%p42_p6, %s40_s18), 0  ;;  %p2031_p9 = scmp.eq.s32.totalorder %s1574_s30, 1 }
  0x57   : > { %2030 = sst [smem:[#allocation29_spill]] %s2071_s18  ;;  %p58_p7 = por %p57_p3, %p56_p10 }
  0x58   : > { %p1678_p12 = por %p2031_p9, %p56_p10  ;;  %s44_s21 = ssub.s32 %s1473_s28, %s2071_s18 }
  0x59   : > { %s1685_s16 = sand.u32 1, %s1465_s26   ;;  %p47_p0 = scmp.eq.s32.totalorder %s44_s21, 0 }
  0x5a   : > { %s2032_s20 = scalar_select %p1678_p12, 1, 0 }
  0x5b   : > { %p1687_p1 = pnand %p1088_p5, %p58_p7  ;;  %s317_s8 = sand.u32 1, %s1477_s29  }
  0x5c   : > { %2033 = sst [smem:[#allocation30_spill]] %s2032_s20  ;;  %s1989_s12 = sshll.u32 %s1685_s16, 4 }
  0x5d   : > { %s2034_s23 = scalar_select %p1687_p1, 1, 0 }
  0x5e   : > { %s1694_s13 = scalar_select %p47_p0, %s1465_s26, %s49_s19  }
  0x5f   : > { %s1990_s24 = sshll.u32 %s1473_s28, 8  ;;  %s2036_s1 = sld [smem:[#allocation32_spill]] }
  0x60   : > { %2035 = sst [smem:[#allocation31_spill]] %s1694_s13  ;;  %s321_s21 = scalar_lea.vmem [#allocation7], %s1989_s12 }
  0x61   : > { %s328_s3 = sshll.u32 %s321_s21, 4  ;;  %s1708_s5 = scalar_lea.sflag [#allocation8], %s317_s8  ;;  %s1706_s3 = int_to_ptr.vmem [resolvable:$true] %s328_s3 }
  0x62   : > { %p1714_p6 = pneg %p1687_p1 }
  0x64   : > { %s2037_s18 = scalar_select %p1714_p6, 1, 0 }
  0x65   : > { %s1702_s17 = scalar_lea.hbm %s2036_s1, %s1990_s24  ;;  %s1238_s12 = scalar_lea.hbm %s2036_s1, 512 }
  0x66   : > { %s1233_s19 = scalar_lea.hbm %s1702_s17, 256  ;;  %p1239_p5 = scmp.lt.u32.totalorder %s1702_s17, %s2036_s1 }
  0x67   : > { %p1234_p2 = scmp.ne.s32.totalorder %s1702_s17, %s1233_s19  ;;  %p1240_p7 = scmp.lt.u32.totalorder %s1238_s12, %s1233_s19 }
  0x68   : > { %p1242_p0 = scmp.lt.u32.totalorder %s1233_s19, %s1702_s17 }
  0x69   : > { %p1236_p10 = pnand %p1714_p6, %p1234_p2  ;;  %p1241_p9 = por %p1240_p7, %p1239_p5 }
  0x6b   : > { %p1237_p3 = pneg %p1236_p10  ;;  %p1243_p12 = por %p1242_p0, %p1241_p9 }
  0x6d   : > { %p1244_p4 = pnand %p1243_p12, %p1237_p3 }
  0x6f   : > { %1247 = shalt.err (!%p1244_p4)
}
  0x70   : > { %s1248_s8 = scalar_lea.vmem %s1706_s3, 256  ;;  %s1487_s15 = smov [#allocation7]  }
  0x71   : > { %p1249_p2 = scmp.ne.s32.totalorder %s1706_s3, %s1248_s8  ;;  %s1253_s10 = sshll.u32 %s1487_s15, 4  ;;  %s1254_s10 = int_to_ptr.vmem [resolvable:$false] %s1253_s10 }
  0x72   : > { %s1255_s24 = scalar_lea.vmem %s1254_s10, 512  ;;  %p1256_p11 = scmp.lt.s32.totalorder %s1706_s3, %s1254_s10 }
  0x73   : > { %p1251_p10 = pnand %p1249_p2, %p1714_p6  ;;  %p1257_p13 = scmp.lt.s32.totalorder %s1255_s24, %s1248_s8 }
  0x75   : > { %p1252_p8 = pneg %p1251_p10  ;;  %p1258_p5 = por %p1257_p13, %p1256_p11 }
  0x77   : > { %p1259_p7 = pnand %p1258_p5, %p1252_p8 }
  0x79   : > { %1262 = shalt.err (!%p1259_p7)
}
  0x7a   : > { %s2038_s12 = smov 4   ;;  %s2039_s19 = smov 64  }
  0x7b   : > { %1076 = dma.hbm_to_vmem [thread:$0]  (!%p1687_p1), %s1702_s17, 256, %s1706_s3, %s1708_s5, %s2039_s19, %s2039_s19, %s2038_s12  }
  0x7c   : > { %s2040_s21 = sshll.u32 %s1473_s28, 8  ;;  %s2041_s10 = sshll.u32 %s1685_s16, 4 }
  0x7d   : > { %s1746_s8 = scalar_lea.hbm %s1975_s2, %s2040_s21  ;;  %s1750_s24 = scalar_lea.vmem [#allocation9], %s2041_s10 }
  0x7e   : > { %s349_s13 = sshll.u32 %s1750_s24, 4  ;;  %s1488_s26 = smov [#allocation12]   ;;  %s1798_s13 = int_to_ptr.vmem [resolvable:$true] %s349_s13 }
  0x7f   : > { %s263_s29 = sshll.u32 %s1488_s26, 4  ;;  %s1489_s7 = smov [#allocation15]   ;;  %s264_s29 = int_to_ptr.vmem [resolvable:$true] %s263_s29 }
  0x80   : > { %s287_s20 = sshll.u32 %s1489_s7, 4  ;;  %s1263_s3 = scalar_lea.hbm %s1977_s4, 16  ;;  %s288_s20 = int_to_ptr.vmem [resolvable:$true] %s287_s20 }
  0x81   : > { %p1264_p4 = scmp.ne.s32.totalorder %s1977_s4, %s1263_s3  ;;  %p2042_p8 = scmp.ne.s32.totalorder %s2028_s22, 0 }
  0x82   : > { %p1270_p12 = scmp.lt.u32.totalorder %s1263_s3, %s1977_s4 }
  0x83   : > { %p1266_p11 = pnand %p1264_p4, %p2042_p8 }
  0x85   : > { %p1267_p13 = pneg %p1266_p11 }
  0x87   : > { %p1272_p3 = pnand %p1270_p12, %p1267_p13 }
  0x89   : > { %1275 = shalt.err (!%p1272_p3)
}
  0x8a   : > { %s1276_s26 = scalar_lea.vmem %s264_s29, 16  ;;  %s1283_s7 = scalar_lea.vmem %s264_s29, 32 }
  0x8b   : > { %p1277_p9 = scmp.ne.s32.totalorder %s264_s29, %s1276_s26  ;;  %p1284_p10 = scmp.lt.s32.totalorder %s264_s29, %s264_s29 }
  0x8c   : > { %p1285_p5 = scmp.lt.s32.totalorder %s1283_s7, %s1276_s26 }
  0x8d   : > { %p1279_p0 = pnand %p1277_p9, %p2042_p8 }
  0x8e   : > { %p1286_p7 = por %p1285_p5, %p1284_p10 }
  0x8f   : > { %p1280_p2 = pneg %p1279_p0 }
  0x91   : > { %p1287_p1 = pnand %p1286_p7, %p1280_p2 }
  0x93   : > { %1290 = shalt.err (!%p1287_p1)
}
  0x94   : > { %p2043_p4 = scmp.ne.s32.totalorder %s2026_s14, 0  ;;  %s1291_s10 = scalar_lea.hbm %s1979_s6, 16 }
  0x95   : > { %p1292_p11 = scmp.ne.s32.totalorder %s1979_s6, %s1291_s10  ;;  %p1298_p1 = scmp.lt.u32.totalorder %s1291_s10, %s1979_s6 }
  0x96   : > { %1063 = dma.hbm_to_vmem [thread:$0]  (!%p2043_p4), %s1977_s4, 16, %s264_s29, [#allocation11]  }
  0x97   : > { %p1294_p13 = pnand %p1292_p11, %p2042_p8 }
  0x99   : > { %p1295_p12 = pneg %p1294_p13 }
  0x9b   : > { %p1300_p3 = pnand %p1298_p1, %p1295_p12 }
  0x9d   : > { %1303 = shalt.err (!%p1300_p3)
}
  0x9e   : > { %s1304_s26 = scalar_lea.vmem %s288_s20, 16  ;;  %s1311_s29 = scalar_lea.vmem %s288_s20, 32 }
  0x9f   : > { %p1305_p9 = scmp.ne.s32.totalorder %s288_s20, %s1304_s26  ;;  %p1312_p10 = scmp.lt.s32.totalorder %s288_s20, %s288_s20 }
  0xa0   : > { %p1313_p5 = scmp.lt.s32.totalorder %s1311_s29, %s1304_s26 }
  0xa1   : > { %p1307_p0 = pnand %p1305_p9, %p2042_p8 }
  0xa2   : > { %p1314_p7 = por %p1313_p5, %p1312_p10 }
  0xa3   : > { %p1308_p2 = pneg %p1307_p0 }
  0xa5   : > { %p1315_p6 = pnand %p1314_p7, %p1308_p2 }
  0xa7   : > { %1318 = shalt.err (!%p1315_p6)
}
  0xa8   : > { %1069 = dma.hbm_to_vmem [thread:$0]  (!%p2043_p4), %s1979_s6, 16, %s288_s20, [#allocation14]  }
  0xa9   : > { %s953_s22 = sshll.u32 %s1685_s16, 3  ;;  %s954_s30 = sshll.u32 %s1473_s28, 7 }
  0xaa   : > { %s1794_s10 = scalar_lea.hbm %s1973_s0, %s954_s30  ;;  %s302_s14 = scalar_lea.vmem [#allocation4], %s953_s22 }
  0xab   : > { %s310_s3 = sshll.u32 %s302_s14, 4  ;;  %s299_s17 = scalar_lea.sflag [#allocation5], %s1685_s16  ;;  %s311_s3 = int_to_ptr.vmem [resolvable:$true] %s310_s3 }
  0xac   : > { %s1319_s1 = scalar_lea.hbm %s1794_s10, 128  ;;  %p2044_p8 = scmp.ne.s32.totalorder %s2037_s18, 0 }
  0xad   : > { %p1320_p6 = scmp.ne.s32.totalorder %s1794_s10, %s1319_s1  ;;  %s1324_s26 = scalar_lea.hbm %s1973_s0, 256 }
  0xae   : > { %p1325_p13 = scmp.lt.u32.totalorder %s1794_s10, %s1973_s0  ;;  %p1326_p12 = scmp.lt.u32.totalorder %s1324_s26, %s1319_s1 }
  0xaf   : > { %p1322_p4 = pnand %p1320_p6, %p2044_p8  ;;  %p1328_p3 = scmp.lt.u32.totalorder %s1319_s1, %s1794_s10 }
  0xb0   : > { %p1327_p1 = por %p1326_p12, %p1325_p13 }
  0xb1   : > { %p1323_p11 = pneg %p1322_p4 }
  0xb2   : > { %p1329_p9 = por %p1328_p3, %p1327_p1 }
  0xb4   : > { %p1330_p0 = pnand %p1329_p9, %p1323_p11 }
  0xb6   : > { %1333 = shalt.err (!%p1330_p0)
}
  0xb7   : > { %s1334_s16 = scalar_lea.vmem %s311_s3, 128  ;;  %s1490_s7 = smov [#allocation4]  }
  0xb8   : > { %p1335_p2 = scmp.ne.s32.totalorder %s311_s3, %s1334_s16  ;;  %s1339_s27 = sshll.u32 %s1490_s7, 4  ;;  %s1340_s27 = int_to_ptr.vmem [resolvable:$false] %s1339_s27 }
  0xb9   : > { %s1341_s22 = scalar_lea.vmem %s1340_s27, 256  ;;  %p1342_p7 = scmp.lt.s32.totalorder %s311_s3, %s1340_s27 }
  0xba   : > { %p1337_p10 = pnand %p1335_p2, %p2044_p8  ;;  %p1343_p6 = scmp.lt.s32.totalorder %s1341_s22, %s1334_s16 }
  0xbc   : > { %p1338_p5 = pneg %p1337_p10  ;;  %p1344_p4 = por %p1343_p6, %p1342_p7 }
  0xbe   : > { %p1345_p12 = pnand %p1344_p4, %p1338_p5 }
  0xc0   : > { %1348 = shalt.err (!%p1345_p12)
}
  0xc1   : > { %p2045_p13 = scmp.ne.s32.totalorder %s2034_s23, 0  ;;  %s1349_s30 = scalar_lea.hbm %s1746_s8, 256 }
  0xc2   : > { %p1350_p11 = scmp.ne.s32.totalorder %s1746_s8, %s1349_s30  ;;  %s1354_s14 = scalar_lea.hbm %s1975_s2, 512 }
  0xc3   : > { %1073 = dma.hbm_to_vmem [thread:$0]  (!%p2045_p13), %s1794_s10, 128, %s311_s3, %s299_s17  }
  0xc4   : > { %p1352_p1 = pnand %p1350_p11, %p2044_p8  ;;  %p1355_p9 = scmp.lt.u32.totalorder %s1746_s8, %s1975_s2 }
  0xc5   : > { %p1356_p0 = scmp.lt.u32.totalorder %s1354_s14, %s1349_s30  ;;  %p1358_p10 = scmp.lt.u32.totalorder %s1349_s30, %s1746_s8 }
  0xc6   : > { %p1353_p3 = pneg %p1352_p1 }
  0xc7   : > { %p1357_p2 = por %p1356_p0, %p1355_p9 }
  0xc9   : > { %p1359_p5 = por %p1358_p10, %p1357_p2 }
  0xcb   : > { %p1360_p7 = pnand %p1359_p5, %p1353_p3 }
  0xcd   : > { %1363 = shalt.err (!%p1360_p7)
}
  0xce   : > { %s1364_s10 = scalar_lea.vmem %s1798_s13, 256  ;;  %s1491_s3 = smov [#allocation9]  }
  0xcf   : > { %p1365_p6 = scmp.ne.s32.totalorder %s1798_s13, %s1364_s10  ;;  %s1369_s17 = sshll.u32 %s1491_s3, 4  ;;  %s1370_s17 = int_to_ptr.vmem [resolvable:$false] %s1369_s17 }
  0xd0   : > { %s1371_s21 = scalar_lea.vmem %s1370_s17, 512  ;;  %p1372_p11 = scmp.lt.s32.totalorder %s1798_s13, %s1370_s17 }
  0xd1   : > { %p1367_p4 = pnand %p1365_p6, %p2044_p8  ;;  %p1373_p1 = scmp.lt.s32.totalorder %s1371_s21, %s1364_s10 }
  0xd3   : > { %p1368_p12 = pneg %p1367_p4  ;;  %p1374_p9 = por %p1373_p1, %p1372_p11 }
  0xd5   : > { %p1375_p0 = pnand %p1374_p9, %p1368_p12 }
  0xd7   : > { %1378 = shalt.err (!%p1375_p0)
}
  0xd8   : > { %1079 = dma.hbm_to_vmem [thread:$0]  (!%p2045_p13), %s1746_s8, 256, %s1798_s13, %s1708_s5, %s2039_s19, %s2039_s19, %s2038_s12  }
  0xd9   : > { %p2046_p8 = scmp.ne.s32.totalorder %s2025_s11, 0 }
  0xda   : > { %s2047_s18 = sld [smem:[#allocation27_spill]] (!%p2046_p8)  ;;  %s1846_s26 = sand.u32 (!%p2046_p8), 1, %s1461_s25  }
  0xdb   : > { %361 = sbr.rel (%p2046_p8) target bundleno = 1694 (0x69e), region = 48  ;;  %s962_s24 = sshll.u32 (!%p2046_p8), %s1846_s26, 3 }
  0xdc   : > { %s364_s29 = scalar_lea.sflag (!%p2046_p8), [#allocation5], %s1846_s26  ;;  %s367_s23 = scalar_lea.vmem (!%p2046_p8), [#allocation4], %s962_s24 }
  0xe0   : > { %p2048_p3 = scmp.ne.s32.totalorder (!%p2046_p8), %s2047_s18, 0 }
  0xe2   : > { %1436 = dma.done.wait (%p2048_p3), %s364_s29, 128  }
  0xe3   : > { %1438 = vsyncadd (%p2048_p3), %s364_s29, 4294967168  ;;  %s2049_s5 = sld [smem:[#allocation26_spill]]  ;;  %s963_s13 = sshll.u32 %s1846_s26, 4 }
  0xe4   : > { %s1858_s19 = scalar_lea.vmem [#allocation7], %s963_s13 }
  0xe9   : > { %s372_s11 = sand.u32 1, %s2049_s5  }
  0xea   : > { %s373_s12 = scalar_lea.sflag [#allocation8], %s372_s11 }
  0xeb   : > { %1440 = dma.done.wait (%p2048_p3), %s373_s12, 512  }
  0xec   : > { %1442 = vsyncadd (%p2048_p3), %s373_s12, 4294966784  ;;  %s1864_s8 = scalar_lea.vmem [#allocation9], %s963_s13  ;;  %p2050_p13 = scmp.eq.s32.totalorder %s2049_s5, 0 }
  0xee   : > { %1444 = dma.done.wait (%p2050_p13), [#allocation11], 272   ;;  %p2051_p2 = pmov %p2050_p13 }
  0xf0   : > { %1446 = vsyncadd (%p2051_p2), [#allocation11], 4294967024  ;;  %p2052_p10 = pmov %p2051_p2 }
  0xf1   : > { %p2053_p5 = pmov %p2051_p2 }
  0xf2   : > { %1448 = dma.done.wait (%p2052_p10), [#allocation14], 272  }
  0xf3   : > { %1450 = vsyncadd (%p2053_p5), [#allocation14], 4294967024  ;;  %v1492_v0 = vmov 0.0   ;;  %vm1493_vm0 = vmmov 0   ;;  %v1166_v1 = vld [vmem:[#allocation10] sm:$0xff]   ;;  %v1167_v2 = vld [vmem:[#allocation10 + $0x8] sm:$0xff]  }
  0xf4   : > { %1005 = vmatprep.subr.bf16.mxu0 %v1492_v0  ;;  %1009 = vmatprep.mubr.msk.bf16.mxu0 %vm1493_vm0, %v1492_v0  ;;  %v443_v3 = vld [vmem:[%s367_s23] sm:$0xff]  ;;  %vm468_vm1 = vcmask 261120   ;;  %vm513_vm2 = vcmask 60416   ;;  %s1494_s16 = smov 104   ;;  %s1495_s7 = smov 120  }
  0xf5   : > { %1006 = vmatpush3.bf16.msra.mxu0 %v1166_v1  ;;  %v444_v4 = vpack.c.bf16 %v443_v3, %v443_v3  ;;  %v970_v5 = vld [vmem:[#allocation12] ss:$0 sm:$0xff]  ;;  %s1496_s27 = smov 112   ;;  %s1885_s22 = scalar_lea.vmem [#allocation16], %s962_s24 }
  0xf6   : > { %1007 = vmatprep.subr.bf16.mxu0 %v1492_v0  ;;  %s1887_s30 = smov 0  }
  0xf9   : > { %1008 = vmatpush3.bf16.msra.mxu0 %v1167_v2 }
  0xfc   : > { %1010 = vmatmul.mubr.msk.bf16.vlgmr.msra.gmra.mrb[0].mxu0 %vm468_vm1, %v444_v4 }
 0x1cf   : > { %v506_v6 = vpop.f32.mrb[0].mxu0 }
 0x1d0   : > { %v507_v7 = vadd.f32 %v970_v5, %v506_v6  ;;  %v1011_v8 = vpop.f32.mrb[1].mxu0 }
 0x1d1   : > { %v509_v9 = vpop.f32.mrb[2].mxu0 }
 0x1d2   : > { %v512_v10 = vpack.c.bf16 %v507_v7, %v507_v7  ;;  %v1012_v11 = vpop.f32.mrb[3].mxu0 }
 0x1d4   : > { %528 = vrot.lane.b32.xlu1 %v512_v10, %s1494_s16  ;;  %518 = vrot.lane.b32.xlu0 %v512_v10, %s1495_s7  ;;  %514 = vst.msk [vmem:[#allocation2] sm:$0xf] %vm513_vm2, %v512_v10 }
 0x1d8   : > { %523 = vrot.lane.b32.xlu0 %v512_v10, %s1496_s27 }
 0x246   : > { %v529_v12 = vpop.permute.xlu1 %528  ;;  %v519_v13 = vpop.permute.xlu0 %518 }
 0x247   : > { %532 = vst.msk [vmem:[#allocation2 + $0xc] sm:$0xf] %vm513_vm2, %v529_v12  ;;  %522 = vst.msk [vmem:[#allocation2 + $0x4] sm:$0xf] %vm513_vm2, %v519_v13 }
 0x24a   : > { %v524_v14 = vpop.permute.xlu0 %523 }
 0x24b   : > { %527 = vst.msk [vmem:[#allocation2 + $0x8] sm:$0xf] %vm513_vm2, %v524_v14 }
 0x24c LB: >> { %v1497_v15 = vmov 0.0   ;;  %vm1498_vm3 = vmmov 0   ;;  %s1893_s9 = sshll.u32 %s1481_s30, 2  ;;  %vm552_vm4 = vcmask 1043456   ;;  %vm548_vm5 = vcmask 64512   ;;  %s538_s30 = sadd.s32 1, %s1481_s30   ;;  %s1481_s30 = sphi %s1887_s30, %s538_s30  }
 0x24d   : >> { %1013 = vmatprep.subr.bf16.mxu0 %v1497_v15  ;;  %1015 = vmatprep.mubr.msk.bf16.mxu0 %vm1498_vm3, %v1497_v15  ;;  %s543_s15 = scalar_lea.vmem %s1858_s19, %s1893_s9 [#allocation7]  ;;  %s540_s14 = scalar_lea.vmem [#allocation2], %s1893_s9 }
 0x24e   : >> { %1019 = vmatprep.subr.bf16.mxu1 %v1497_v15  ;;  %1021 = vmatprep.mubr.msk.bf16.mxu1 %vm1498_vm3, %v1497_v15  ;;  %v544_v16 = vld [vmem:[%s543_s15] sm:$0xf]  ;;  %s546_s1 = scalar_lea.vmem %s1864_s8, %s1893_s9 [#allocation9]  ;;  %s656_s20 = scalar_lea.vmem [#allocation3], %s1893_s9 }
 0x24f   : >> { %v554_v17 = vsel %vm552_vm4, %v544_v16, 0  ;;  %v547_v29 = vld [vmem:[%s546_s1] sm:$0xf]  ;;  %p535_p7 = scmp.ge.s32.totalorder %s538_s30, 4  }
 0x250   : >> { %1014 = vmatpush3.bf16.msra.mxu0 %v554_v17  ;;  %v612_v30 = vsel %vm552_vm4, %v547_v29, 0  ;;  %s1499_s10 = smov (%p535_p7), 8   ;;  %v1175_v43 = vld [vmem:[#allocation13] sm:$0xff] (%p535_p7)   ;;  %s1500_s3 = smov (%p535_p7), 24   ;;  %v1176_v44 = vld [vmem:[#allocation13 + $0x8] sm:$0xff] (%p535_p7)   ;;  %vm684_vm6 = vcmask (%p535_p7), 130048  }
 0x251   : >> { %1020 = vmatpush3.bf16.msra.mxu1 %v612_v30  ;;  %1025 = vmatprep.subr.bf16.mxu0 (%p535_p7), %v1492_v0  ;;  %s2054_s17 = sld [smem:[#allocation24_spill]] (%p535_p7)  ;;  %s1501_s21 = smov (%p535_p7), 16   ;;  %vm687_vm7 = vcmask (%p535_p7), 195584   ;;  %v984_v52 = vld [vmem:[#allocation15] ss:$0 sm:$0xff] (%p535_p7) }
 0x252   : >> { %v541_v18 = vld [vmem:[%s540_s14] sm:$0xf]  ;;  %s2055_s18 = sld [smem:[#allocation30_spill]] (%p535_p7)  ;;  %s771_s29 = sshll.u32 (%p535_p7), %s1885_s22, 4  ;;  %s1924_s29 = int_to_ptr.vmem [resolvable:$true] %s771_s29 }
 0x253   : >> { %1016 = vmatmul.mubr.msk.bf16.vlgmr.msra.gmra.mrb[0].mxu0 %vm548_vm5, %v541_v18  ;;  %s2056_s11 = sld [smem:[#allocation35_spill]] (%p535_p7)  ;;  %s757_s12 = scalar_lea.sflag (%p535_p7), [#allocation6], %s1846_s26 }
 0x254   : > { %1029 = vmatprep.mubr.msk.bf16.mxu0 (%p535_p7), %vm1493_vm0, %v1492_v0  ;;  %1026 = vmatpush3.bf16.msra.mxu0 (%p535_p7), %v1175_v43  ;;  %s1379_s19 = scalar_lea.vmem (%p535_p7), %s1924_s29, 128  ;;  %s1502_s8 = smov (%p535_p7), [#allocation16]  }
 0x255   : > { %1027 = vmatprep.subr.bf16.mxu0 (%p535_p7), %v1492_v0  ;;  %p1380_p6 = scmp.ne.s32.totalorder (%p535_p7), %s1924_s29, %s1379_s19  ;;  %s1383_s16 = sshll.u32 (%p535_p7), %s1502_s8, 4  ;;  %s1384_s16 = int_to_ptr.vmem [resolvable:$false] %s1383_s16 }
 0x256   : > { %s1385_s7 = scalar_lea.vmem (%p535_p7), %s1384_s16, 256  ;;  %p1386_p1 = scmp.lt.s32.totalorder (%p535_p7), %s1924_s29, %s1384_s16 }
 0x257   : > { %s989_s24 = sshll.u32 (%p535_p7), %s2054_s17, 7  ;;  %p1387_p9 = scmp.lt.s32.totalorder (%p535_p7), %s1385_s7, %s1379_s19 }
 0x258   : > { %1028 = vmatpush3.bf16.msra.mxu0 (%p535_p7), %v1176_v44  ;;  %p2057_p4 = scmp.ne.s32.totalorder (%p535_p7), %s2055_s18, 0 }
 0x259   : > { %s1922_s13 = scalar_lea.hbm (%p535_p7), %s2056_s11, %s989_s24  ;;  %p1388_p0 = por (%p535_p7), %p1387_p9, %p1386_p1 }
 0x25a   : > { %p1381_p12 = pnand (%p535_p7), %p1380_p6, %p2057_p4 }
 0x25c   : > { %p1382_p11 = pneg (%p535_p7), %p1381_p12 }
 0x25e   : > { %p1389_p8 = pnand (%p535_p7), %p1388_p0, %p1382_p11 }
 0x326   : >> { %v590_v19 = vpop.f32.mrb[0].mxu0 }
 0x327   : >> { %v1017_v20 = vpop.f32.mrb[1].mxu0  ;;  %v596_v21 = vsel %vm548_vm5, %v590_v19, -inf }
 0x328   : >> { %597 = vmax.xlane.f32.xlu0 %v596_v21  ;;  %v593_v22 = vpop.f32.mrb[2].mxu0 }
 0x329   : >> { %v1018_v23 = vpop.f32.mrb[3].mxu0 }
 0x3b5   : >> { %v598_v24 = vpop.xlane.xlu0 %597 }
 0x3b6   : >> { %v599_v25 = vsub.f32 %v590_v19, %v598_v24 }
 0x3b8   : >> { %v600_v26 = vmul.f32 1.442695, %v599_v25 }
 0x3ba   : >> { %1168 = vpow2.f32 %v600_v26 }
 0x3c4   : >> { %v1169_v27 = vpop.eup %1168 }
 0x3c5   : >> { %v602_v28 = vsel %vm548_vm5, %v1169_v27, 0.0 }
 0x3c6   : >> { %603 = vadd.xlane.f32.xlu0 %v602_v28 }
 0x453   : >> { %v604_v31 = vpop.xlane.xlu0 %603 }
 0x454   : >> { %1170 = vrcp.f32 %v604_v31 }
 0x45e   : >> { %v1171_v32 = vpop.eup %1170 }
 0x45f   : >> { %v606_v33 = vmul.f32 %v1171_v32, %v1169_v27 }
 0x461   : >> { %v607_v34 = vpack.c.bf16 %v606_v33, %v606_v33 }
 0x463   : >> { %1022 = vmatmul.mubr.msk.bf16.vlgmr.msra.gmra.mrb[0].mxu1 %vm548_vm5, %v607_v34 }
 0x533   : > { %537 = sbr.rel (!%p535_p7) target bundleno = 588 (0x24c), region = 150 }
 0x536   : >> { %v648_v35 = vpop.f32.mrb[0].mxu1 }
 0x537   : >> { %v654_v36 = vpack.c.bf16 %v648_v35, %v648_v35  ;;  %v1023_v37 = vpop.f32.mrb[1].mxu1 }
 0x538   : >> { %v651_v38 = vpop.f32.mrb[2].mxu1 }
 0x539   : >> { %657 = vst.msk [vmem:[%s656_s20] sm:$0xf] %vm513_vm2, %v654_v36  ;;  %v1024_v39 = vpop.f32.mrb[3].mxu1 }
 0x540   : > { %v1172_v40 = vld [vmem:[#allocation3 + $0x4] ss:$0 sps:$4 sm:$0xff]   ;;  %v1173_v41 = vld [vmem:[#allocation3 + $0x8] ss:$0 sps:$4 sm:$0xff]   ;;  %v1174_v42 = vld [vmem:[#allocation3 + $0xc] ss:$0 sps:$4 sm:$0xff]  }
 0x541   : > { %668 = vrot.lane.b32.xlu0 %v1172_v40, %s1499_s10  ;;  %678 = vrot.lane.b32.xlu1 %v1174_v42, %s1500_s3  ;;  %v658_v46 = vld [vmem:[#allocation3] sm:$0xf] }
 0x545   : > { %673 = vrot.lane.b32.xlu0 %v1173_v41, %s1501_s21 }
 0x5b3   : > { %v669_v45 = vpop.permute.xlu0 %668  ;;  %v679_v47 = vpop.permute.xlu1 %678 }
 0x5b4   : > { %v683_v48 = vsel %vm548_vm5, %v658_v46, %v669_v45 }
 0x5b7   : > { %v674_v49 = vpop.permute.xlu0 %673 }
 0x5b8   : > { %v686_v50 = vsel %vm684_vm6, %v683_v48, %v674_v49 }
 0x5b9   : > { %v689_v51 = vsel %vm687_vm7, %v686_v50, %v679_v47 }
 0x5ba   : > { %1030 = vmatmul.mubr.msk.bf16.vlgmr.msra.gmra.mrb[0].mxu0 %vm468_vm1, %v689_v51 }
 0x68d   : > { %v749_v53 = vpop.f32.mrb[0].mxu0 }
 0x68e   : > { %v750_v54 = vadd.f32 %v984_v52, %v749_v53  ;;  %v1031_v55 = vpop.f32.mrb[1].mxu0 }
 0x68f   : > { %v752_v56 = vpop.f32.mrb[2].mxu0 }
 0x690   : > { %755 = vst.msk [vmem:[%s1885_s22] sm:$0xff] %vm468_vm1, %v750_v54  ;;  %v1032_v57 = vpop.f32.mrb[3].mxu0 }
 0x691   : > { %1392 = shalt.err (!%p1389_p8)
}
 0x692   : > { %s1393_s26 = scalar_lea.hbm %s1922_s13, 128  ;;  %s1397_s30 = scalar_lea.hbm %s2056_s11, 256 }
 0x693   : > { %p1394_p3 = scmp.ne.s32.totalorder %s1922_s13, %s1393_s26  ;;  %p1398_p10 = scmp.lt.u32.totalorder %s1922_s13, %s2056_s11 }
 0x694   : > { %p1399_p5 = scmp.lt.u32.totalorder %s1397_s30, %s1393_s26  ;;  %p1401_p6 = scmp.lt.u32.totalorder %s1393_s26, %s1922_s13 }
 0x695   : > { %p1395_p13 = pnand %p1394_p3, %p2057_p4 }
 0x696   : > { %p1400_p7 = por %p1399_p5, %p1398_p10 }
 0x697   : > { %p1396_p2 = pneg %p1395_p13 }
 0x698   : > { %p1402_p12 = por %p1401_p6, %p1400_p7 }
 0x69a   : > { %p1403_p11 = pnand %p1402_p12, %p1396_p2 }
 0x69c   : > { %1406 = shalt.err (!%p1403_p11)
}
 0x69d   : > { %1055 = dma.vmem_to_hbm [thread:$0]  (%p2057_p4), %s1924_s29, 128, %s1922_s13, %s757_s12  }
 0x69e PF: > { %s2058_s14 = sld [smem:[#allocation22_spill]]  ;;  %s2059_s1 = sld [smem:[#allocation28_spill]] }
 0x69f   : > { %s2060_s20 = sld [smem:[#allocation25_spill]] }
 0x6a4   : > { %s783_s10 = sand.u32 1, %s2058_s14   ;;  %p2061_p1 = scmp.ne.s32.totalorder %s2059_s1, 0 }
 0x6a5   : > { %p2062_p9 = scmp.ge.s32.totalorder %s2060_s20, 2  ;;  %s784_s3 = scalar_lea.sflag [#allocation6], %s783_s10 }
 0x6a7   : > { %p1081_p0 = pnand %p2062_p9, %p2061_p1 }
 0x6a9   : > { %1452 = dma.done.wait (!%p1081_p0), %s784_s3, 128  }
 0x6aa   : > { %1454 = vsyncadd (!%p1081_p0), %s784_s3, 4294967168  ;;  %s28_s29 = sadd.s32 1, %s2060_s20   ;;  %s2063_s17 = sld [smem:[#allocation23_spill]] }
 0x6ab   : > { %p25_p8 = scmp.ge.s32.totalorder %s28_s29, 4   ;;  %s2064_s26 = sld [smem:[#allocation31_spill]] }
 0x6ac   : > { %s2065_s21 = sld [smem:[#allocation29_spill]]  ;;  %s2066_s24 = smov %s1461_s25 }
 0x6ad   : > { %s2068_s27 = smov %s1473_s28  ;;  %27 = sbr.rel (!%p25_p8) target bundleno = 15 (0xf), region = 161 }
 0x6b0   : > { %s2067_s25 = smov %s2063_s17 }
 0x6b2   : > { %s2069_s28 = smov %s2065_s21 }
 0x6b4   :  { %789 = vsyncpa [#allocation5], 1 }
 0x6b5   :  { %791 = vsyncpa [#allocation5 + $0x1], 1 }
 0x6b6   :  { %792 = vsyncpa [#allocation8], 1 }
 0x6b7   :  { %794 = vsyncpa [#allocation8 + $0x1], 1 }
 0x6b8   :  { %795 = vsyncpa [#allocation11], 1 }
 0x6b9   :  { %796 = vsyncpa [#allocation14], 1 }
 0x6ba   :  { %797 = vsyncpa [#allocation6], 1 }
 0x6bb   :  { %799 = vsyncpa [#allocation6 + $0x1], 1 }

</bundles_post_ra>
